<compile_context>
chip_gen: v7x
topology: tpu7x:2x2x1
jax: 0.10.0
libtpu: 0.0.40
codegen_flags: <defaults>
</compile_context>

<pallas_src>
import functools

import jax
import jax.numpy as jnp
from jax.experimental import pallas as pl
from jax.experimental.pallas import tpu as pltpu


def _round_up(x, m):
    return ((x + m - 1) // m) * m


def _vmem_capacity_bytes():
    """Physical VMEM per TensorCore; conservative 64 MiB fallback (v7x)."""
    try:
        info = pltpu.get_tpu_info()
        cap = getattr(info, "vmem_capacity_bytes", None)
        if cap:
            return int(cap)
    except Exception:  # query unavailable (e.g. interpret mode / old runtime)
        pass
    return 64 * 1024 * 1024


def _bert_generator_kernel(x_ref, w_ref, b_ref, o_ref, m_ref, l_ref, *, nj, tn, tail):
    """One (row-tile i, vocab-tile j) grid step.

    x_ref: (tm, H)   hidden rows (native dtype, resident across j)
    w_ref: (H, tn)   weight tile, pre-transposed [H, V] layout (streamed over j)
    b_ref: (1, tn)   bias tile
    o_ref: (tm, V)   output log-prob slab (f32), resident across the j axis
    m_ref, l_ref: (tm, 1) f32 online-softmax running max / sum-exp
    """
    j = pl.program_id(1)

    @pl.when(j == 0)
    def _init():
        m_ref[...] = jnp.full(m_ref.shape, -jnp.inf, dtype=jnp.float32)
        l_ref[...] = jnp.zeros(l_ref.shape, dtype=jnp.float32)

    # Linear: x @ W_t (no transpose in the kernel; MXU-native layout).
    # f32 accumulation is the module's Cast(torch.float32) point.
    logits = jnp.dot(x_ref[...], w_ref[...], preferred_element_type=jnp.float32)
    logits = logits + b_ref[...].astype(jnp.float32)

    col0 = pl.multiple_of(j * tn, 128) if tn % 128 == 0 else j * tn

    def _process(width):
        sub = logits[:, :width]
        # Stash raw logits into the resident output slab (VMEM only; the slab
        # is written back to HBM once per row tile, after the last j).
        o_ref[:, pl.ds(col0, width)] = sub
        # Online (streaming) log-softmax statistics across vocab tiles.
        tile_max = jnp.max(sub, axis=-1, keepdims=True)
        m_new = jnp.maximum(m_ref[...], tile_max)
        alpha = jnp.exp(m_ref[...] - m_new)
        l_ref[...] = alpha * l_ref[...] + jnp.sum(
            jnp.exp(sub - m_new), axis=-1, keepdims=True)
        m_ref[...] = m_new

    if tail == tn:                      # vocab divides evenly: single path
        _process(tn)
    else:                               # last vocab tile is partial
        @pl.when(j < nj - 1)
        def _full_tile():
            _process(tn)

        @pl.when(j == nj - 1)
        def _tail_tile():
            _process(tail)

    @pl.when(j == nj - 1)
    def _finalize():
        # log_softmax = logits - (m + log(sum_exp)); lane-dense full-slab store.
        lse = m_ref[...] + jnp.log(l_ref[...])
        o_ref[...] = o_ref[...] - lse


def _bert_generator_forward_2d(hidden, weight, bias, *, tm, tn):
    """hidden: [N, H]; weight: [V, H] (PyTorch Linear layout); bias: [V]."""
    N, H = hidden.shape
    V, H2 = weight.shape
    assert H2 == H, "weight must be [vocab, dec_rnn_size]"
    assert bias.shape == (V,), "bias must be [vocab]"

    in_bytes = jnp.dtype(hidden.dtype).itemsize
    w_bytes = jnp.dtype(weight.dtype).itemsize
    b_bytes = jnp.dtype(bias.dtype).itemsize

    # --- VMEM-aware tile sizing -------------------------------------------
    vmem_cap = _vmem_capacity_bytes()
    budget = vmem_cap - (8 << 20)          # leave headroom for compiler scratch

    # Vocab tile: multiple of 128 (or the full V when V <= tn); shrink if the
    # double-buffered (H, tn) weight stream would dominate VMEM.
    tn_req = max(128, (max(tn, 128) // 128) * 128)
    tn_eff = V if V <= tn_req else tn_req
    while tn_eff > 128 and 2 * H * tn_eff * w_bytes > budget // 3:
        new_tn = max(128, ((tn_eff // 2) // 128) * 128)
        if new_tn == tn_eff:
            break
        tn_eff = new_tn

    # Row tile: dtype-aware sublane rounding (8/16/32 for 4/2/1-byte hidden),
    # clamped so the double-buffered f32 output slab + hidden tiles fit VMEM.
    sub = {4: 8, 2: 16, 1: 32}.get(in_bytes, 8)
    tm_req = max(sub, _round_up(min(tm, _round_up(N, sub)), sub))
    per_row_bytes = 2 * V * 4 + 2 * H * in_bytes          # out slab + hidden (x2 buffers)
    fixed_bytes = 2 * H * tn_eff * w_bytes + 2 * tn_eff * b_bytes + (64 << 10)
    tm_cap = (budget - fixed_bytes) // per_row_bytes
    tm_cap = max(sub, (tm_cap // sub) * sub)
    tm_eff = min(tm_req, tm_cap)
    # TODO(synk): for very large V on 64 MiB-VMEM parts (tm_cap == sub still too
    # big) a per-(i,j) HBM logits + lse fixup pass would be needed; not hit at
    # these shapes.

    ni = pl.cdiv(N, tm_eff)
    nj = pl.cdiv(V, tn_eff)
    tail = V - (nj - 1) * tn_eff

    # One-time HBM transpose to [H, V] so the MXU gets a native (tm,H)x(H,tn)
    # contraction with no per-tile vxpose through the XLU.
    weight_t = jnp.transpose(weight)
    bias2 = bias.reshape(1, V)

    kernel = functools.partial(
        _bert_generator_kernel, nj=nj, tn=tn_eff, tail=tail)

    vmem_needed = (fixed_bytes + tm_eff * per_row_bytes + 4 * tm_eff * 4)
    vmem_limit = int(min(vmem_cap - (4 << 20),
                         max(32 << 20, vmem_needed * 5 // 4 + (2 << 20))))

    cost = pl.CostEstimate(
        flops=2 * N * V * H,
        transcendentals=N * V,
        bytes_accessed=(N * H * in_bytes            # hidden read
                        + ni * V * H * w_bytes      # weight streamed once per row tile
                        + V * b_bytes               # bias
                        + N * V * 4),               # f32 log-prob writeback
    )

    return pl.pallas_call(
        kernel,
        out_shape=jax.ShapeDtypeStruct((N, V), jnp.float32),
        grid_spec=pltpu.PrefetchScalarGridSpec(
            num_scalar_prefetch=0,
            grid=(ni, nj),
            in_specs=[
                pl.BlockSpec((tm_eff, H), lambda i, j: (i, 0)),   # hidden rows (resident over j)
                pl.BlockSpec((H, tn_eff), lambda i, j: (0, j)),   # streamed [H,V]-layout weight tile
                pl.BlockSpec((1, tn_eff), lambda i, j: (0, j)),   # bias tile
            ],
            out_specs=pl.BlockSpec((tm_eff, V), lambda i, j: (i, 0)),  # resident slab over j
            scratch_shapes=[
                pltpu.VMEM((tm_eff, 1), jnp.float32),   # running max
                pltpu.VMEM((tm_eff, 1), jnp.float32),   # running sum-exp
            ],
        ),
        compiler_params=pltpu.CompilerParams(
            dimension_semantics=("parallel", "arbitrary"),
            vmem_limit_bytes=vmem_limit,
        ),
        cost_estimate=cost,
    )(hidden, weight_t, bias2)


def bert_generator_forward(hidden, weight, bias, *, tm=512, tn=2048,
                           cast_to_bf16=False):
    """BertGenerator.forward(hidden, tgts=None).

    hidden: [..., dec_rnn_size]; weight: [vocab, dec_rnn_size] (PyTorch Linear
    layout); bias: [vocab].  Returns log_probs: [..., vocab] float32.

    cast_to_bf16: optionally cast f32 hidden/weight to bf16 before the kernel
    (MXU-native, halves weight HBM traffic) while keeping f32 accumulation.
    Off by default to match the PyTorch f32 Linear exactly.
    """
    H = hidden.shape[-1]
    V = weight.shape[0]
    x2d = hidden.reshape(-1, H)

    if cast_to_bf16 and x2d.dtype == jnp.float32:
        x2d = x2d.astype(jnp.bfloat16)
        weight = weight.astype(jnp.bfloat16)

    out = _bert_generator_forward_2d(x2d, weight, bias, tm=tm, tn=tn)
    return out.reshape(hidden.shape[:-1] + (V,))


def _reference(hidden, weight, bias):
    logits = (hidden @ weight.T + bias).astype(jnp.float32)
    return jax.nn.log_softmax(logits, axis=-1)


if __name__ == "__main__":
    key = jax.random.PRNGKey(0)
    k1, k2, k3, k4, k5, k6 = jax.random.split(key, 6)

    # Case 1: module-consistent small shapes (batch=2, seq=8, dec_rnn_size=32,
    # vocab=128); exercises the 3-D hidden path and a single vocab tile.
    batch, seq, dec_rnn_size, vocab = 2, 8, 32, 128
    hidden = jax.random.normal(k1, (batch, seq, dec_rnn_size), dtype=jnp.float32)
    weight = jax.random.normal(k2, (vocab, dec_rnn_size), dtype=jnp.float32) * 0.05
    bias = jax.random.normal(k3, (vocab,), dtype=jnp.float32) * 0.01

    log_probs = jax.block_until_ready(bert_generator_forward(hidden, weight, bias))
    ref = _reference(hidden.reshape(-1, dec_rnn_size), weight, bias).reshape(
        batch, seq, vocab)
    assert log_probs.shape == (batch, seq, vocab)
    assert log_probs.dtype == jnp.float32
    assert jnp.allclose(log_probs, ref, atol=2e-5, rtol=2e-5)

    # Case 2: exercise the ragged paths (row count not a tile multiple, vocab
    # streamed over two tiles with a tail, padded last row tile).
    N2, H2, V2 = 20, 32, 384
    hidden2 = jax.random.normal(k4, (N2, H2), dtype=jnp.float32)
    weight2 = jax.random.normal(k5, (V2, H2), dtype=jnp.float32) * 0.05
    bias2 = jax.random.normal(k6, (V2,), dtype=jnp.float32) * 0.01

    log_probs2 = jax.block_until_ready(
        bert_generator_forward(hidden2, weight2, bias2, tm=128, tn=256))
    ref2 = _reference(hidden2, weight2, bias2)
    assert log_probs2.shape == (N2, V2)
    assert jnp.allclose(log_probs2, ref2, atol=2e-5, rtol=2e-5)

    print("KERNEL_OK")
</pallas_src>

<mosaic_0001>
module attributes {stable_mosaic.version = 11 : i64} {
  func.func @_bert_generator_kernel(%arg0: i32, %arg1: i32, %arg2: memref<16x32xf32, #tpu.memory_space<vmem>>, %arg3: memref<32x128xf32, #tpu.memory_space<vmem>>, %arg4: memref<1x128xf32, #tpu.memory_space<vmem>>, %arg5: memref<16x128xf32, #tpu.memory_space<vmem>>, %arg6: memref<16x1xf32, #tpu.memory_space<vmem>>, %arg7: memref<16x1xf32, #tpu.memory_space<vmem>>) attributes {dimension_semantics = [#tpu.dimension_semantics<parallel>, #tpu.dimension_semantics<arbitrary>], iteration_bounds = array<i64: 1, 1>, scalar_prefetch = 0 : i64, scratch_operands = 2 : i64, tpu.core_type = #tpu.core_type<tc>, window_params = [{transform_indices = @transform_0, window_bounds = array<i64: 16, 32>}, {transform_indices = @transform_1, window_bounds = array<i64: 32, 128>}, {transform_indices = @transform_2, window_bounds = array<i64: 1, 128>}, {transform_indices = @transform_3, window_bounds = array<i64: 16, 128>}]} {
    %c0_i32 = arith.constant 0 : i32
    %0 = arith.cmpi eq, %arg1, %c0_i32 : i32
    %1 = arith.extui %0 : i1 to i32
    %c0_i32_0 = arith.constant 0 : i32
    %2 = arith.cmpi ne, %1, %c0_i32_0 : i32
    scf.if %2 {
      %cst_21 = arith.constant 0xFF800000 : f32
      %33 = vector.broadcast %cst_21 : f32 to vector<16x1xf32>
      %c0_22 = arith.constant 0 : index
      %c0_23 = arith.constant 0 : index
      %34 = vector.load %arg6[%c0_22, %c0_23] : memref<16x1xf32, #tpu.memory_space<vmem>>, vector<16x1xf32>
      tpu.vector_store %arg6[%c0_22, %c0_23], %33 {strides = array<i32>} : memref<16x1xf32, #tpu.memory_space<vmem>>, vector<16x1xf32>,
      %cst_24 = arith.constant 0.000000e+00 : f32
      %35 = vector.broadcast %cst_24 : f32 to vector<16x1xf32>
      %c0_25 = arith.constant 0 : index
      %c0_26 = arith.constant 0 : index
      %36 = vector.load %arg7[%c0_25, %c0_26] : memref<16x1xf32, #tpu.memory_space<vmem>>, vector<16x1xf32>
      tpu.vector_store %arg7[%c0_25, %c0_26], %35 {strides = array<i32>} : memref<16x1xf32, #tpu.memory_space<vmem>>, vector<16x1xf32>,
    } else {
    }
    %c0 = arith.constant 0 : index
    %c0_1 = arith.constant 0 : index
    %3 = vector.load %arg2[%c0, %c0_1] : memref<16x32xf32, #tpu.memory_space<vmem>>, vector<16x32xf32>
    %c0_2 = arith.constant 0 : index
    %c0_3 = arith.constant 0 : index
    %4 = vector.load %arg3[%c0_2, %c0_3] : memref<32x128xf32, #tpu.memory_space<vmem>>, vector<32x128xf32>
    %cst = arith.constant dense<0.000000e+00> : vector<16x128xf32>
    %5 = tpu.matmul %3, %4, %cst {dimension_numbers = #tpu.dot_dimension_numbers<[1], [0], [0], [1], [0, 0, 1, 1], [], []>} : vector<16x32xf32>, vector<32x128xf32>, vector<16x128xf32> -> vector<16x128xf32>
    %c0_4 = arith.constant 0 : index
    %c0_5 = arith.constant 0 : index
    %6 = vector.load %arg4[%c0_4, %c0_5] : memref<1x128xf32, #tpu.memory_space<vmem>>, vector<1x128xf32>
    %7 = vector.broadcast %6 : vector<1x128xf32> to vector<16x128xf32>
    %8 = arith.addf %5, %7 : vector<16x128xf32>
    %c128_i32 = arith.constant 128 : i32
    %9 = arith.muli %arg1, %c128_i32 : i32
    %10 = tpu.assume_multiple %9, 128 : i32
    %c0_6 = arith.constant 0 : index
    %11 = arith.index_cast %10 : i32 to index
    %12 = vector.load %arg5[%c0_6, %11] : memref<16x128xf32, #tpu.memory_space<vmem>>, vector<16x128xf32>
    tpu.vector_store %arg5[%c0_6, %11], %8 {strides = array<i32>} : memref<16x128xf32, #tpu.memory_space<vmem>>, vector<16x128xf32>,
    %cst_7 = arith.constant dense<0xFF800000> : vector<16xf32>
    %13 = vector.multi_reduction <maximumf>, %8, %cst_7 [1] : vector<16x128xf32> to vector<16xf32>
    %14 = vector.shape_cast %13 : vector<16xf32> to vector<16x1xf32>
    %c0_8 = arith.constant 0 : index
    %c0_9 = arith.constant 0 : index
    %15 = vector.load %arg6[%c0_8, %c0_9] : memref<16x1xf32, #tpu.memory_space<vmem>>, vector<16x1xf32>
    %16 = arith.maximumf %15, %14 : vector<16x1xf32>
    %c0_10 = arith.constant 0 : index
    %c0_11 = arith.constant 0 : index
    %17 = vector.load %arg6[%c0_10, %c0_11] : memref<16x1xf32, #tpu.memory_space<vmem>>, vector<16x1xf32>
    %18 = arith.subf %17, %16 : vector<16x1xf32>
    %19 = math.exp %18 : vector<16x1xf32>
    %c0_12 = arith.constant 0 : index
    %c0_13 = arith.constant 0 : index
    %20 = vector.load %arg7[%c0_12, %c0_13] : memref<16x1xf32, #tpu.memory_space<vmem>>, vector<16x1xf32>
    %21 = arith.mulf %19, %20 : vector<16x1xf32>
    %22 = vector.broadcast %16 : vector<16x1xf32> to vector<16x128xf32>
    %23 = arith.subf %8, %22 : vector<16x128xf32>
    %24 = math.exp %23 : vector<16x128xf32>
    %cst_14 = arith.constant dense<0.000000e+00> : vector<16xf32>
    %25 = vector.multi_reduction <add>, %24, %cst_14 [1] : vector<16x128xf32> to vector<16xf32>
    %26 = vector.shape_cast %25 : vector<16xf32> to vector<16x1xf32>
    %27 = arith.addf %21, %26 : vector<16x1xf32>
    %c0_15 = arith.constant 0 : index
    %c0_16 = arith.constant 0 : index
    %28 = vector.load %arg7[%c0_15, %c0_16] : memref<16x1xf32, #tpu.memory_space<vmem>>, vector<16x1xf32>
    tpu.vector_store %arg7[%c0_15, %c0_16], %27 {strides = array<i32>} : memref<16x1xf32, #tpu.memory_space<vmem>>, vector<16x1xf32>,
    %c0_17 = arith.constant 0 : index
    %c0_18 = arith.constant 0 : index
    %29 = vector.load %arg6[%c0_17, %c0_18] : memref<16x1xf32, #tpu.memory_space<vmem>>, vector<16x1xf32>
    tpu.vector_store %arg6[%c0_17, %c0_18], %16 {strides = array<i32>} : memref<16x1xf32, #tpu.memory_space<vmem>>, vector<16x1xf32>,
    %c0_i32_19 = arith.constant 0 : i32
    %30 = arith.cmpi eq, %arg1, %c0_i32_19 : i32
    %31 = arith.extui %30 : i1 to i32
    %c0_i32_20 = arith.constant 0 : i32
    %32 = arith.cmpi ne, %31, %c0_i32_20 : i32
    scf.if %32 {
      %c0_21 = arith.constant 0 : index
      %c0_22 = arith.constant 0 : index
      %33 = vector.load %arg6[%c0_21, %c0_22] : memref<16x1xf32, #tpu.memory_space<vmem>>, vector<16x1xf32>
      %c0_23 = arith.constant 0 : index
      %c0_24 = arith.constant 0 : index
      %34 = vector.load %arg7[%c0_23, %c0_24] : memref<16x1xf32, #tpu.memory_space<vmem>>, vector<16x1xf32>
      %35 = math.log %34 : vector<16x1xf32>
      %36 = arith.addf %33, %35 : vector<16x1xf32>
      %c0_25 = arith.constant 0 : index
      %c0_26 = arith.constant 0 : index
      %37 = vector.load %arg5[%c0_25, %c0_26] : memref<16x128xf32, #tpu.memory_space<vmem>>, vector<16x128xf32>
      %38 = vector.broadcast %36 : vector<16x1xf32> to vector<16x128xf32>
      %39 = arith.subf %37, %38 : vector<16x128xf32>
      %c0_27 = arith.constant 0 : index
      %c0_28 = arith.constant 0 : index
      %40 = vector.load %arg5[%c0_27, %c0_28] : memref<16x128xf32, #tpu.memory_space<vmem>>, vector<16x128xf32>
      tpu.vector_store %arg5[%c0_27, %c0_28], %39 {strides = array<i32>} : memref<16x128xf32, #tpu.memory_space<vmem>>, vector<16x128xf32>,
    } else {
    }
    return
  }
  func.func @transform_0(%arg0: i32, %arg1: i32) -> (i32, i32) {
    %c0_i32 = arith.constant 0 : i32
    %c0_i32_0 = arith.constant 0 : i32
    return %arg0, %c0_i32 : i32, i32
  }
  func.func @transform_1(%arg0: i32, %arg1: i32) -> (i32, i32) {
    %c0_i32 = arith.constant 0 : i32
    %c0_i32_0 = arith.constant 0 : i32
    return %c0_i32, %arg1 : i32, i32
  }
  func.func @transform_2(%arg0: i32, %arg1: i32) -> (i32, i32) {
    %c0_i32 = arith.constant 0 : i32
    %c0_i32_0 = arith.constant 0 : i32
    return %c0_i32, %arg1 : i32, i32
  }
  func.func @transform_3(%arg0: i32, %arg1: i32) -> (i32, i32) {
    %c0_i32 = arith.constant 0 : i32
    %c0_i32_0 = arith.constant 0 : i32
    return %arg0, %c0_i32 : i32, i32
  }
}

</mosaic_0001>

<bundles_post_ra>
// kernel: tpu_custom_call.1
= control target key start
LH: loop header
LB: loop body
LE: loop exit
PB: predicated region body
PF: predicated region fallthrough
CT: control target
= control target key end

     0   :  { %8 = vsyncpa [#allocation5], 0  ;;  %s462_s0 = inlined_call_operand.hbm [shape: f32[16,32], index: 0, kind: input, shape index: {}]   ;;  %s463_s1 = inlined_call_operand.hbm [shape: f32[32,128], index: 1, kind: input, shape index: {}]   ;;  %s464_s2 = inlined_call_operand.vmem [shape: f32[1,128], index: 2, kind: input, shape index: {}]   ;;  %s465_s3 = inlined_call_operand.hbm [shape: f32[16,128], index: 3, kind: output, shape index: {}]  }
   0x1   :  { %9 = vsyncpa [#allocation8], 0 }
   0x2   :  { %10 = vsyncpa [#allocation6], 0  ;;  %s368_s12 = smov [#allocation4]   ;;  %s296_s16 = scalar_lea.hbm %s462_s0, 256 }
   0x3   :  { %s16_s13 = sshll.u32 %s368_s12, 4  ;;  %p297_p0 = scmp.ne.s32.totalorder %s462_s0, %s296_s16  ;;  %s17_s13 = int_to_ptr.vmem [resolvable:$true] %s16_s13 }
   0x4   :  { %p300_p1 = scmp.lt.u32.totalorder %s296_s16, %s462_s0 }
   0x6   :  { %p302_p2 = pnand %p300_p1, %p297_p0 }
   0x8   :  { %305 = shalt.err (!%p302_p2)
}
   0x9   :  { %s306_s21 = scalar_lea.vmem %s17_s13, 256  ;;  %p311_p4 = scmp.lt.s32.totalorder %s17_s13, %s17_s13 }
   0xa   :  { %p307_p3 = scmp.ne.s32.totalorder %s17_s13, %s306_s21  ;;  %p312_p5 = scmp.lt.s32.totalorder %s306_s21, %s306_s21 }
   0xc   :  { %p313_p6 = por %p312_p5, %p311_p4 }
   0xe   :  { %p314_p7 = pnand %p313_p6, %p307_p3 }
  0x10   :  { %317 = shalt.err (!%p314_p7)
}
  0x11   :  { %s369_s22 = smov 128   ;;  %s370_s23 = smov 8  }
  0x12   :  { %22 = dma.hbm_to_vmem [thread:$0]  %s462_s0, 256, %s17_s13, [#allocation5], %s369_s22, %s369_s22, %s370_s23  }
  0x13   :  { %s371_s26 = smov [#allocation7]   ;;  %s318_s30 = scalar_lea.hbm %s463_s1, 512 }
  0x14   :  { %s28_s27 = sshll.u32 %s371_s26, 4  ;;  %p319_p8 = scmp.ne.s32.totalorder %s463_s1, %s318_s30  ;;  %s29_s27 = int_to_ptr.vmem [resolvable:$true] %s28_s27 }
  0x15   :  { %p322_p9 = scmp.lt.u32.totalorder %s318_s30, %s463_s1 }
  0x17   :  { %p324_p10 = pnand %p322_p9, %p319_p8 }
  0x19   :  { %327 = shalt.err (!%p324_p10)
}
  0x1a   :  { %s328_s8 = scalar_lea.vmem %s29_s27, 512  ;;  %p333_p12 = scmp.lt.s32.totalorder %s29_s27, %s29_s27 }
  0x1b   :  { %p329_p11 = scmp.ne.s32.totalorder %s29_s27, %s328_s8  ;;  %p334_p13 = scmp.lt.s32.totalorder %s328_s8, %s328_s8 }
  0x1d   :  { %p335_p0 = por %p334_p13, %p333_p12 }
  0x1f   :  { %p336_p1 = pnand %p335_p0, %p329_p11 }
  0x21   :  { %339 = shalt.err (!%p336_p1)
}
  0x22   :  { %34 = dma.hbm_to_vmem [thread:$0]  %s463_s1, 512, %s29_s27, [#allocation8], %s369_s22, %s369_s22, %s370_s23  }
  0x23   :  { %362 = dma.done.wait [#allocation5], 256  }
  0x24   :  { %363 = vsyncadd [#allocation5], 4294967040 }
  0x25   :  { %364 = dma.done.wait [#allocation8], 512  }
  0x26   :  { %365 = vsyncadd [#allocation8], 4294966784  ;;  %vm65_vm0 = vcmask 261120   ;;  %v54_v0 = vld [vmem:[#allocation7] sm:$0xff]  ;;  %v55_v1 = vld [vmem:[#allocation7 + $0x8] sm:$0xff]  ;;  %vm47_vm1 = vcmask 7168  }
  0x27   :  { %v56_v2 = vld [vmem:[#allocation7 + $0x10] sm:$0xff]  ;;  %v266_v3 = vpack.c.bf16 %v55_v1, %v54_v0  ;;  %v57_v4 = vld [vmem:[#allocation7 + $0x18] sm:$0xff]  ;;  %v372_v8 = vmov -inf   ;;  %v373_v14 = vmov 0   ;;  %v374_v15 = vmov 0.0  }
  0x28   :  { %v52_v5 = vld [vmem:[#allocation4] sm:$0xff]  ;;  %v270_v6 = vpack.c.bf16 %v57_v4, %v56_v2  ;;  %v53_v7 = vld [vmem:[#allocation4 + $0x8] sm:$0xff]  ;;  %48 = vst.msk [vmem:[#allocation2] sm:$0xff] %vm47_vm1, %v372_v8  ;;  %49 = vst.msk [vmem:[#allocation2 + $0x8] sm:$0xff] %vm47_vm1, %v372_v8  ;;  %282 = vset.pattern.permute.xlu1 %v373_v14  ;;  %283 = vset.pattern.permute.xlu0 %v373_v14 }
  0x29   :  { %263 = vmatprep.mubr.msk.f32.mxu0 %vm65_vm0, %v52_v5  ;;  %267 = vmatprep.subr.bf16.mxu0 %v266_v3  ;;  %v246_v9 = vld [vmem:[%s464_s2] ss:$0 sm:$0xff]  ;;  %50 = vst.msk [vmem:[#allocation3] sm:$0xff] %vm47_vm1, %v374_v15  ;;  %51 = vst.msk [vmem:[#allocation3 + $0x8] sm:$0xff] %vm47_vm1, %v374_v15  ;;  %s375_s2 = smov [#allocation9]  }
  0x2a   :  { %269 = vmatpush3.bf16.msra.mxu0 %v266_v3  ;;  %s232_s11 = sshll.u32 %s375_s2, 4  ;;  %s233_s11 = int_to_ptr.vmem [resolvable:$true] %s232_s11 }
  0x2b   :  { %271 = vmatprep.subr.bf16.mxu0 %v270_v6  ;;  %s340_s12 = scalar_lea.vmem %s233_s11, 256  ;;  %p345_p3 = scmp.lt.s32.totalorder %s233_s11, %s233_s11 }
  0x2c   :  { %p341_p2 = scmp.ne.s32.totalorder %s233_s11, %s340_s12  ;;  %p346_p4 = scmp.lt.s32.totalorder %s340_s12, %s340_s12 }
  0x2e   :  { %273 = vmatpush3.bf16.msra.mxu0 %v270_v6  ;;  %p347_p5 = por %p346_p4, %p345_p3 }
  0x2f   :  { %v157_v16 = vld [vmem:[#allocation2] sm:$0xff]  ;;  %v158_v19 = vld [vmem:[#allocation2 + $0x8] sm:$0xff] }
  0x30   :  { %v167_v35 = vld [vmem:[#allocation3] sm:$0xff]  ;;  %v168_v39 = vld [vmem:[#allocation3 + $0x8] sm:$0xff]  ;;  %p348_p6 = pnand %p347_p5, %p341_p2 }
  0x31   :  { %264 = vmatmul.mubr.msk.f32.vlgmr.msra.gmra.mrb[0].mxu0 %vm65_vm0, %v53_v7 }
 0x104   :  { %v265_v10 = vpop.f32.mrb[0].mxu0 }
 0x105   :  { %v138_v11 = vpop.f32.mrb[1].mxu0  ;;  %v434_v13 = vadd.f32 %v265_v10, %v246_v9 }
 0x106   :  { %v431_v12 = vadd.f32 %v246_v9, %v138_v11 }
 0x108   :  { %153 = vmax.xlane.f32.xlu0 %v431_v12 }
 0x10c   :  { %155 = vmax.xlane.f32.xlu0 %v434_v13 }
 0x195   :  { %v154_v17 = vpop.xlane.xlu0 %153 }
 0x196   :  { %v159_v18 = vmax.f32 %v157_v16, %v154_v17 }
 0x198   :  { %v161_v20 = vsub.f32 %v157_v16, %v159_v18  ;;  %196 = vst.msk [vmem:[#allocation2] sm:$0xff] %vm47_vm1, %v159_v18  ;;  %173 = vperm.xlu1 %282, %v159_v18  }
 0x199   :  { %v156_v21 = vpop.xlane.xlu0 %155 }
 0x19a   :  { %v160_v22 = vmax.f32 %v158_v19, %v156_v21  ;;  %v163_v32 = vmul.f32 1.442695, %v161_v20 }
 0x19c   :  { %v162_v23 = vsub.f32 %v158_v19, %v160_v22  ;;  %197 = vst.msk [vmem:[#allocation2 + $0x8] sm:$0xff] %vm47_vm1, %v160_v22  ;;  %178 = vperm.xlu1 %282, %v160_v22  }
 0x19e   :  { %v165_v33 = vmul.f32 1.442695, %v162_v23 }
 0x19f   :  { %v201_v48 = vld [vmem:[#allocation2] sm:$0xff] }
 0x1a3   :  { %v202_v52 = vld [vmem:[#allocation2 + $0x8] sm:$0xff] }
 0x217   :  { %v174_v24 = vpop.permute.xlu1 %173 }
 0x218   :  { %v181_v25 = vsub.f32 %v431_v12, %v174_v24 }
 0x21a   :  { %v183_v26 = vmul.f32 1.442695, %v181_v25 }
 0x21b   :  { %v179_v27 = vpop.permute.xlu1 %178 }
 0x21c   :  { %284 = vpow2.f32 %v183_v26  ;;  %v182_v28 = vsub.f32 %v434_v13, %v179_v27 }
 0x21e   :  { %v185_v29 = vmul.f32 1.442695, %v182_v28 }
 0x220   :  { %286 = vpow2.f32 %v185_v29 }
 0x221   :  { %288 = vpow2.f32 %v163_v32 }
 0x222   :  { %290 = vpow2.f32 %v165_v33 }
 0x226   :  { %v285_v30 = vpop.eup %284 }
 0x227   :  { %187 = vadd.xlane.f32.xlu0 %v285_v30 }
 0x22a   :  { %v287_v31 = vpop.eup %286 }
 0x22b   :  { %189 = vadd.xlane.f32.xlu1 %v287_v31  ;;  %v289_v34 = vpop.eup %288 }
 0x22c   :  { %v169_v36 = vmul.f32 %v289_v34, %v167_v35  ;;  %v291_v37 = vpop.eup %290 }
 0x22d   :  { %v170_v41 = vmul.f32 %v291_v37, %v168_v39 }
 0x2b4   :  { %v188_v38 = vpop.xlane.xlu0 %187 }
 0x2b5   :  { %v191_v40 = vadd.f32 %v188_v38, %v169_v36 }
 0x2b7   :  { %194 = vst.msk [vmem:[#allocation3] sm:$0xff] %vm47_vm1, %v191_v40 }
 0x2b8   :  { %v190_v42 = vpop.xlane.xlu1 %189 }
 0x2b9   :  { %v192_v43 = vadd.f32 %v190_v42, %v170_v41 }
 0x2bb   :  { %195 = vst.msk [vmem:[#allocation3 + $0x8] sm:$0xff] %vm47_vm1, %v192_v43 }
 0x2be   :  { %v203_v44 = vld [vmem:[#allocation3] sm:$0xff] }
 0x2bf   :  { %292 = vlog2.f32 %v203_v44 }
 0x2c2   :  { %v204_v45 = vld [vmem:[#allocation3 + $0x8] sm:$0xff] }
 0x2c3   :  { %294 = vlog2.f32 %v204_v45 }
 0x2c9   :  { %v293_v46 = vpop.eup %292 }
 0x2ca   :  { %v206_v47 = vmul.f32 0.6931472, %v293_v46 }
 0x2cc   :  { %v209_v49 = vadd.f32 %v206_v47, %v201_v48 }
 0x2cd   :  { %v295_v50 = vpop.eup %294 }
 0x2ce   :  { %215 = vperm.xlu0 %283, %v209_v49   ;;  %v208_v51 = vmul.f32 0.6931472, %v295_v50 }
 0x2d0   :  { %v210_v53 = vadd.f32 %v208_v51, %v202_v52 }
 0x2d2   :  { %220 = vperm.xlu1 %282, %v210_v53  }
 0x34d   :  { %v216_v54 = vpop.permute.xlu0 %215 }
 0x34e   :  { %v223_v55 = vsub.f32 %v431_v12, %v216_v54 }
 0x350   :  { %225 = vst [vmem:[#allocation9] sm:$0xff] %v223_v55 }
 0x351   :  { %v221_v56 = vpop.permute.xlu1 %220 }
 0x352   :  { %v224_v57 = vsub.f32 %v434_v13, %v221_v56 }
 0x354   :  { %226 = vst [vmem:[#allocation9 + $0x8] sm:$0xff] %v224_v57 }
 0x355   :  { %351 = shalt.err (!%p348_p6)
}
 0x356   :  { %s352_s15 = scalar_lea.hbm %s465_s3, 256 }
 0x357   :  { %p353_p7 = scmp.ne.s32.totalorder %s465_s3, %s352_s15  ;;  %p356_p8 = scmp.lt.u32.totalorder %s352_s15, %s465_s3 }
 0x359   :  { %p358_p9 = pnand %p356_p8, %p353_p7 }
 0x35b   :  { %361 = shalt.err (!%p358_p9)
}
 0x35c   :  { %238 = dma.vmem_to_hbm [thread:$0]  %s233_s11, 256, %s465_s3, [#allocation6], %s369_s22, %s369_s22, %s370_s23  }
 0x35d   :  { %366 = dma.done.wait [#allocation6], 256  }
 0x35e   :  { %367 = vsyncadd [#allocation6], 4294967040 }
 0x35f   :  { %242 = vsyncpa [#allocation5], 1 }
 0x360   :  { %243 = vsyncpa [#allocation8], 1 }
 0x361   :  { %244 = vsyncpa [#allocation6], 1 }

</bundles_post_ra>
